<compile_context>
chip_gen: v5e
topology: v5e:2x2
jax: 0.10.0
libtpu: 0.0.40
codegen_flags: <defaults>
</compile_context>

<pallas_src>
from functools import partial

import jax
import jax.numpy as jnp
from jax.experimental import pallas as pl
from jax.experimental.pallas import tpu as pltpu

IN_DIM = 5
HID_DIM = 50
OUT_DIM = 5
N_HIDDEN = 6               # six hidden ReLU layers
N_LAYERS = N_HIDDEN + 1    # + final linear layer = 7 linear layers

LANE = 128                 # padded hidden feature width
SUB = 8                    # sublane granularity
IN_PAD = 8                 # padded input-feature width (lane dim of x)
OUT_PAD = 8                # padded output-feature width (lane dim of out)
TB_MAX = 8192              # max batch-tile rows
MIN_TILES = 4              # target minimum number of grid steps


def _round_up(n, m):
    return ((n + m - 1) // m) * m


def _cdiv(a, b):
    return -(-a // b)


def _acas_mlp_kernel(x_ref, w0_ref, w_ref, wl_ref, b_ref, bl_ref, out_ref):
    """One batch tile through the 7-layer ACASXU MLP.

    x_ref  : [TB, 8]        bf16  input features, zero-padded 5 -> 8
    w0_ref : [8, 128]       bf16  layer-0 weight, zero-padded (5 x 50)
    w_ref  : [5, 128, 128]  bf16  layers 1..5 weights, zero-padded (50 x 50)
    wl_ref : [128, 8]       bf16  layer-6 weight, zero-padded (50 x 5)
    b_ref  : [8, 128]       f32   row i = bias of hidden layer i (rows 6,7 unused)
    bl_ref : [1, 8]         f32   final-layer bias, zero-padded 5 -> 8
    out_ref: [TB, 8]        f32   only [:, :5] is meaningful
    """
    bias = b_ref[...]                                          # single [8,128] load

    # Layer 0: [TB,8] @ [8,128] on the MXU (bf16 in, f32 accumulate).
    h = jnp.dot(x_ref[...], w0_ref[...], preferred_element_type=jnp.float32)
    h = jnp.maximum(h + bias[0:1, :], 0.0).astype(jnp.bfloat16)

    # Hidden layers 1..5 (unrolled): [TB,128] @ [128,128], bias + ReLU in f32,
    # activations carried in bf16.
    for i in range(N_HIDDEN - 1):
        h = jnp.dot(h, w_ref[i], preferred_element_type=jnp.float32)
        h = jnp.maximum(h + bias[i + 1:i + 2, :], 0.0).astype(jnp.bfloat16)

    # Final layer 6: [TB,128] @ [128,8] -> narrow [TB,8] output (no ReLU).
    o = jnp.dot(h, wl_ref[...], preferred_element_type=jnp.float32)
    out_ref[...] = o + bl_ref[...]


def make_acas_params(key):
    """Deterministic synthetic ACASXU weights (5 -> 50x6 -> 5), packed & padded.

    Returns:
      w0     [8, 128]       bf16   layer 0
      w_mid  [5, 128, 128]  bf16   layers 1..5
      w_last [128, 8]       bf16   layer 6
      b_hid  [8, 128]       f32    rows 0..5 = hidden-layer biases
      b_last [1, 8]         f32    final-layer bias
    """
    # TODO(synk): the original module torch.load()s pretrained ACASXU weights;
    # synthetic weights of the same architecture are used here instead.
    dims = [IN_DIM] + [HID_DIM] * N_HIDDEN + [OUT_DIM]
    w0 = None
    w_mid = []
    w_last = None
    b_rows = []
    b_last = None
    for i in range(N_LAYERS):
        key, kw, kb = jax.random.split(key, 3)
        fan_in = dims[i]
        w = jax.random.normal(kw, (dims[i], dims[i + 1]), jnp.float32) / jnp.sqrt(fan_in)
        b = 0.01 * jax.random.normal(kb, (dims[i + 1],), jnp.float32)
        if i == 0:
            w0 = jnp.zeros((IN_PAD, LANE), jnp.float32).at[:dims[i], :dims[i + 1]].set(w)
            b_rows.append(jnp.zeros((LANE,), jnp.float32).at[:dims[i + 1]].set(b))
        elif i < N_LAYERS - 1:
            w_mid.append(
                jnp.zeros((LANE, LANE), jnp.float32).at[:dims[i], :dims[i + 1]].set(w))
            b_rows.append(jnp.zeros((LANE,), jnp.float32).at[:dims[i + 1]].set(b))
        else:
            w_last = jnp.zeros((LANE, OUT_PAD), jnp.float32).at[:dims[i], :dims[i + 1]].set(w)
            b_last = jnp.zeros((1, OUT_PAD), jnp.float32).at[0, :dims[i + 1]].set(b)

    w0 = w0.astype(jnp.bfloat16)
    w_mid = jnp.stack(w_mid).astype(jnp.bfloat16)               # [5,128,128]
    w_last = w_last.astype(jnp.bfloat16)                        # [128,8]
    b_hid = jnp.zeros((SUB, LANE), jnp.float32).at[:N_HIDDEN].set(jnp.stack(b_rows))
    return w0, w_mid, w_last, b_hid, b_last


@partial(jax.jit, static_argnames=("tb_max",))
def acas_forward(x, y, w0, w_mid, w_last, b_hid, b_last, *, tb_max=TB_MAX):
    """Equivalent of Model.forward(x, y): returns self.model(x)."""
    # TODO(synk): get_acas_state_torch(x, y) is computed then discarded in the
    # original forward; it has no effect on the output so it is omitted. y unused.
    del y

    B = x.shape[0]
    # Balanced tiling with >= MIN_TILES grid steps (pipelining + v7x megacore),
    # capped at tb_max rows per tile; tb is a multiple of 8.
    n_tiles = max(MIN_TILES, _cdiv(B, tb_max))
    tb = _round_up(_cdiv(B, n_tiles), SUB)
    bp = _round_up(B, tb)
    grid = bp // tb

    # Single cheap wrapper copy: pad batch + 5->8 feature lanes, cast to bf16.
    x_pad = jnp.pad(x, ((0, bp - B), (0, IN_PAD - IN_DIM))).astype(jnp.bfloat16)

    out = pl.pallas_call(
        _acas_mlp_kernel,
        out_shape=jax.ShapeDtypeStruct((bp, OUT_PAD), jnp.float32),
        grid_spec=pltpu.PrefetchScalarGridSpec(
            num_scalar_prefetch=0,
            grid=(grid,),
            in_specs=[
                pl.BlockSpec((tb, IN_PAD), lambda i: (i, 0)),                  # x tile
                pl.BlockSpec((IN_PAD, LANE), lambda i: (0, 0)),                # w0 (resident)
                pl.BlockSpec((N_HIDDEN - 1, LANE, LANE), lambda i: (0, 0, 0)),  # w1..5
                pl.BlockSpec((LANE, OUT_PAD), lambda i: (0, 0)),               # w6 (narrow)
                pl.BlockSpec((SUB, LANE), lambda i: (0, 0)),                   # hidden biases
                pl.BlockSpec((1, OUT_PAD), lambda i: (0, 0)),                  # final bias
            ],
            out_specs=pl.BlockSpec((tb, OUT_PAD), lambda i: (i, 0)),
        ),
        compiler_params=pltpu.CompilerParams(
            dimension_semantics=("parallel",),       # shard batch tiles across TCs (v7x)
            vmem_limit_bytes=32 * 1024 * 1024,       # ample for tb=8192 with 8-lane out
        ),
    )(x_pad, w0, w_mid, w_last, b_hid, b_last)

    return out[:B, :OUT_DIM]                          # [B, 5]


def _reference_forward(x, w0, w_mid, w_last, b_hid, b_last):
    """Plain-JAX reference with identical bf16-in / f32-accumulate math."""
    h = jnp.pad(x, ((0, 0), (0, IN_PAD - IN_DIM))).astype(jnp.bfloat16)
    h = jnp.dot(h, w0, preferred_element_type=jnp.float32)
    h = jnp.maximum(h + b_hid[0:1, :], 0.0).astype(jnp.bfloat16)
    for i in range(N_HIDDEN - 1):
        h = jnp.dot(h, w_mid[i], preferred_element_type=jnp.float32)
        h = jnp.maximum(h + b_hid[i + 1:i + 2, :], 0.0).astype(jnp.bfloat16)
    o = jnp.dot(h, w_last, preferred_element_type=jnp.float32) + b_last
    return o[:, :OUT_DIM]


if __name__ == "__main__":
    key = jax.random.PRNGKey(0)
    k_param, k_x, k_y = jax.random.split(key, 3)

    w0, w_mid, w_last, b_hid, b_last = make_acas_params(k_param)

    # Small test: B=20 -> tb=8, bp=24, grid=(3,), exercising multi-step
    # pipelining, batch padding, and the resident-weight index maps.
    B = 20
    x = jax.random.normal(k_x, (B, IN_DIM), jnp.float32)   # ACAS state (rho, theta, psi, v_own, v_int)
    y = jax.random.normal(k_y, (B, 3), jnp.float32)        # aux state, unused by the output

    out = acas_forward(x, y, w0, w_mid, w_last, b_hid, b_last)
    out = jax.block_until_ready(out)

    ref = _reference_forward(x, w0, w_mid, w_last, b_hid, b_last)
    assert out.shape == (B, OUT_DIM)
    assert jnp.allclose(out, ref, atol=1e-2, rtol=1e-2), \
        f"max abs err = {float(jnp.max(jnp.abs(out - ref)))}"

    print("KERNEL_OK")
</pallas_src>

<mosaic_0001>
module attributes {stable_mosaic.version = 11 : i64} {
  func.func @_acas_mlp_kernel(%arg0: i32, %arg1: memref<8x8xbf16, #tpu.memory_space<vmem>>, %arg2: memref<8x128xbf16, #tpu.memory_space<vmem>>, %arg3: memref<5x128x128xbf16, #tpu.memory_space<vmem>>, %arg4: memref<128x8xbf16, #tpu.memory_space<vmem>>, %arg5: memref<8x128xf32, #tpu.memory_space<vmem>>, %arg6: memref<1x8xf32, #tpu.memory_space<vmem>>, %arg7: memref<8x8xf32, #tpu.memory_space<vmem>>) attributes {dimension_semantics = [#tpu.dimension_semantics<parallel>], iteration_bounds = array<i64: 3>, scalar_prefetch = 0 : i64, scratch_operands = 0 : i64, tpu.core_type = #tpu.core_type<tc>, window_params = [{transform_indices = @transform_0, window_bounds = array<i64: 8, 8>}, {pipeline_mode = #tpu.pipeline_mode<synchronous>, transform_indices = @transform_1, window_bounds = array<i64: 8, 128>}, {pipeline_mode = #tpu.pipeline_mode<synchronous>, transform_indices = @transform_2, window_bounds = array<i64: 5, 128, 128>}, {pipeline_mode = #tpu.pipeline_mode<synchronous>, transform_indices = @transform_3, window_bounds = array<i64: 128, 8>}, {pipeline_mode = #tpu.pipeline_mode<synchronous>, transform_indices = @transform_4, window_bounds = array<i64: 8, 128>}, {pipeline_mode = #tpu.pipeline_mode<synchronous>, transform_indices = @transform_5, window_bounds = array<i64: 1, 8>}, {transform_indices = @transform_6, window_bounds = array<i64: 8, 8>}]} {
    %c0 = arith.constant 0 : index
    %c0_0 = arith.constant 0 : index
    %0 = vector.load %arg5[%c0, %c0_0] : memref<8x128xf32, #tpu.memory_space<vmem>>, vector<8x128xf32>
    %c0_1 = arith.constant 0 : index
    %c0_2 = arith.constant 0 : index
    %1 = vector.load %arg1[%c0_1, %c0_2] : memref<8x8xbf16, #tpu.memory_space<vmem>>, vector<8x8xbf16>
    %c0_3 = arith.constant 0 : index
    %c0_4 = arith.constant 0 : index
    %2 = vector.load %arg2[%c0_3, %c0_4] : memref<8x128xbf16, #tpu.memory_space<vmem>>, vector<8x128xbf16>
    %cst = arith.constant dense<0.000000e+00> : vector<8x128xf32>
    %3 = tpu.matmul %1, %2, %cst {dimension_numbers = #tpu.dot_dimension_numbers<[1], [0], [0], [1], [0, 0, 1, 1], [], []>} : vector<8x8xbf16>, vector<8x128xbf16>, vector<8x128xf32> -> vector<8x128xf32>
    %4 = vector.extract_strided_slice %0 {offsets = [0, 0], sizes = [1, 128], strides = [1, 1]} : vector<8x128xf32> to vector<1x128xf32>
    %5 = vector.broadcast %4 : vector<1x128xf32> to vector<8x128xf32>
    %6 = arith.addf %3, %5 : vector<8x128xf32>
    %cst_5 = arith.constant 0.000000e+00 : f32
    %7 = vector.broadcast %cst_5 : f32 to vector<8x128xf32>
    %8 = arith.maximumf %6, %7 : vector<8x128xf32>
    %9 = arith.truncf %8 : vector<8x128xf32> to vector<8x128xbf16>
    %c0_6 = arith.constant 0 : index
    %c0_7 = arith.constant 0 : index
    %c0_8 = arith.constant 0 : index
    %10 = vector.load %arg3[%c0_6, %c0_7, %c0_8] : memref<5x128x128xbf16, #tpu.memory_space<vmem>>, vector<1x128x128xbf16>
    %11 = vector.shape_cast %10 : vector<1x128x128xbf16> to vector<128x128xbf16>
    %cst_9 = arith.constant dense<0.000000e+00> : vector<8x128xf32>
    %12 = tpu.matmul %9, %11, %cst_9 {dimension_numbers = #tpu.dot_dimension_numbers<[1], [0], [0], [1], [0, 0, 1, 1], [], []>} : vector<8x128xbf16>, vector<128x128xbf16>, vector<8x128xf32> -> vector<8x128xf32>
    %13 = vector.extract_strided_slice %0 {offsets = [1, 0], sizes = [1, 128], strides = [1, 1]} : vector<8x128xf32> to vector<1x128xf32>
    %14 = vector.broadcast %13 : vector<1x128xf32> to vector<8x128xf32>
    %15 = arith.addf %12, %14 : vector<8x128xf32>
    %cst_10 = arith.constant 0.000000e+00 : f32
    %16 = vector.broadcast %cst_10 : f32 to vector<8x128xf32>
    %17 = arith.maximumf %15, %16 : vector<8x128xf32>
    %18 = arith.truncf %17 : vector<8x128xf32> to vector<8x128xbf16>
    %c1 = arith.constant 1 : index
    %c0_11 = arith.constant 0 : index
    %c0_12 = arith.constant 0 : index
    %19 = vector.load %arg3[%c1, %c0_11, %c0_12] : memref<5x128x128xbf16, #tpu.memory_space<vmem>>, vector<1x128x128xbf16>
    %20 = vector.shape_cast %19 : vector<1x128x128xbf16> to vector<128x128xbf16>
    %cst_13 = arith.constant dense<0.000000e+00> : vector<8x128xf32>
    %21 = tpu.matmul %18, %20, %cst_13 {dimension_numbers = #tpu.dot_dimension_numbers<[1], [0], [0], [1], [0, 0, 1, 1], [], []>} : vector<8x128xbf16>, vector<128x128xbf16>, vector<8x128xf32> -> vector<8x128xf32>
    %22 = vector.extract_strided_slice %0 {offsets = [2, 0], sizes = [1, 128], strides = [1, 1]} : vector<8x128xf32> to vector<1x128xf32>
    %23 = vector.broadcast %22 : vector<1x128xf32> to vector<8x128xf32>
    %24 = arith.addf %21, %23 : vector<8x128xf32>
    %cst_14 = arith.constant 0.000000e+00 : f32
    %25 = vector.broadcast %cst_14 : f32 to vector<8x128xf32>
    %26 = arith.maximumf %24, %25 : vector<8x128xf32>
    %27 = arith.truncf %26 : vector<8x128xf32> to vector<8x128xbf16>
    %c2 = arith.constant 2 : index
    %c0_15 = arith.constant 0 : index
    %c0_16 = arith.constant 0 : index
    %28 = vector.load %arg3[%c2, %c0_15, %c0_16] : memref<5x128x128xbf16, #tpu.memory_space<vmem>>, vector<1x128x128xbf16>
    %29 = vector.shape_cast %28 : vector<1x128x128xbf16> to vector<128x128xbf16>
    %cst_17 = arith.constant dense<0.000000e+00> : vector<8x128xf32>
    %30 = tpu.matmul %27, %29, %cst_17 {dimension_numbers = #tpu.dot_dimension_numbers<[1], [0], [0], [1], [0, 0, 1, 1], [], []>} : vector<8x128xbf16>, vector<128x128xbf16>, vector<8x128xf32> -> vector<8x128xf32>
    %31 = vector.extract_strided_slice %0 {offsets = [3, 0], sizes = [1, 128], strides = [1, 1]} : vector<8x128xf32> to vector<1x128xf32>
    %32 = vector.broadcast %31 : vector<1x128xf32> to vector<8x128xf32>
    %33 = arith.addf %30, %32 : vector<8x128xf32>
    %cst_18 = arith.constant 0.000000e+00 : f32
    %34 = vector.broadcast %cst_18 : f32 to vector<8x128xf32>
    %35 = arith.maximumf %33, %34 : vector<8x128xf32>
    %36 = arith.truncf %35 : vector<8x128xf32> to vector<8x128xbf16>
    %c3 = arith.constant 3 : index
    %c0_19 = arith.constant 0 : index
    %c0_20 = arith.constant 0 : index
    %37 = vector.load %arg3[%c3, %c0_19, %c0_20] : memref<5x128x128xbf16, #tpu.memory_space<vmem>>, vector<1x128x128xbf16>
    %38 = vector.shape_cast %37 : vector<1x128x128xbf16> to vector<128x128xbf16>
    %cst_21 = arith.constant dense<0.000000e+00> : vector<8x128xf32>
    %39 = tpu.matmul %36, %38, %cst_21 {dimension_numbers = #tpu.dot_dimension_numbers<[1], [0], [0], [1], [0, 0, 1, 1], [], []>} : vector<8x128xbf16>, vector<128x128xbf16>, vector<8x128xf32> -> vector<8x128xf32>
    %40 = vector.extract_strided_slice %0 {offsets = [4, 0], sizes = [1, 128], strides = [1, 1]} : vector<8x128xf32> to vector<1x128xf32>
    %41 = vector.broadcast %40 : vector<1x128xf32> to vector<8x128xf32>
    %42 = arith.addf %39, %41 : vector<8x128xf32>
    %cst_22 = arith.constant 0.000000e+00 : f32
    %43 = vector.broadcast %cst_22 : f32 to vector<8x128xf32>
    %44 = arith.maximumf %42, %43 : vector<8x128xf32>
    %45 = arith.truncf %44 : vector<8x128xf32> to vector<8x128xbf16>
    %c4 = arith.constant 4 : index
    %c0_23 = arith.constant 0 : index
    %c0_24 = arith.constant 0 : index
    %46 = vector.load %arg3[%c4, %c0_23, %c0_24] : memref<5x128x128xbf16, #tpu.memory_space<vmem>>, vector<1x128x128xbf16>
    %47 = vector.shape_cast %46 : vector<1x128x128xbf16> to vector<128x128xbf16>
    %cst_25 = arith.constant dense<0.000000e+00> : vector<8x128xf32>
    %48 = tpu.matmul %45, %47, %cst_25 {dimension_numbers = #tpu.dot_dimension_numbers<[1], [0], [0], [1], [0, 0, 1, 1], [], []>} : vector<8x128xbf16>, vector<128x128xbf16>, vector<8x128xf32> -> vector<8x128xf32>
    %49 = vector.extract_strided_slice %0 {offsets = [5, 0], sizes = [1, 128], strides = [1, 1]} : vector<8x128xf32> to vector<1x128xf32>
    %50 = vector.broadcast %49 : vector<1x128xf32> to vector<8x128xf32>
    %51 = arith.addf %48, %50 : vector<8x128xf32>
    %cst_26 = arith.constant 0.000000e+00 : f32
    %52 = vector.broadcast %cst_26 : f32 to vector<8x128xf32>
    %53 = arith.maximumf %51, %52 : vector<8x128xf32>
    %54 = arith.truncf %53 : vector<8x128xf32> to vector<8x128xbf16>
    %c0_27 = arith.constant 0 : index
    %c0_28 = arith.constant 0 : index
    %55 = vector.load %arg4[%c0_27, %c0_28] : memref<128x8xbf16, #tpu.memory_space<vmem>>, vector<128x8xbf16>
    %cst_29 = arith.constant dense<0.000000e+00> : vector<8x8xf32>
    %56 = tpu.matmul %54, %55, %cst_29 {dimension_numbers = #tpu.dot_dimension_numbers<[1], [0], [0], [1], [0, 0, 1, 1], [], []>} : vector<8x128xbf16>, vector<128x8xbf16>, vector<8x8xf32> -> vector<8x8xf32>
    %c0_30 = arith.constant 0 : index
    %c0_31 = arith.constant 0 : index
    %57 = vector.load %arg6[%c0_30, %c0_31] : memref<1x8xf32, #tpu.memory_space<vmem>>, vector<1x8xf32>
    %58 = vector.broadcast %57 : vector<1x8xf32> to vector<8x8xf32>
    %59 = arith.addf %56, %58 : vector<8x8xf32>
    %c0_32 = arith.constant 0 : index
    %c0_33 = arith.constant 0 : index
    %60 = vector.load %arg7[%c0_32, %c0_33] : memref<8x8xf32, #tpu.memory_space<vmem>>, vector<8x8xf32>
    tpu.vector_store %arg7[%c0_32, %c0_33], %59 {strides = array<i32>} : memref<8x8xf32, #tpu.memory_space<vmem>>, vector<8x8xf32>,
    return
  }
  func.func @transform_0(%arg0: i32) -> (i32, i32) {
    %c0_i32 = arith.constant 0 : i32
    %c0_i32_0 = arith.constant 0 : i32
    return %arg0, %c0_i32 : i32, i32
  }
  func.func @transform_1(%arg0: i32) -> (i32, i32) {
    %c0_i32 = arith.constant 0 : i32
    %c0_i32_0 = arith.constant 0 : i32
    %c0_i32_1 = arith.constant 0 : i32
    return %c0_i32, %c0_i32_0 : i32, i32
  }
  func.func @transform_2(%arg0: i32) -> (i32, i32, i32) {
    %c0_i32 = arith.constant 0 : i32
    %c0_i32_0 = arith.constant 0 : i32
    %c0_i32_1 = arith.constant 0 : i32
    %c0_i32_2 = arith.constant 0 : i32
    return %c0_i32, %c0_i32_0, %c0_i32_1 : i32, i32, i32
  }
  func.func @transform_3(%arg0: i32) -> (i32, i32) {
    %c0_i32 = arith.constant 0 : i32
    %c0_i32_0 = arith.constant 0 : i32
    %c0_i32_1 = arith.constant 0 : i32
    return %c0_i32, %c0_i32_0 : i32, i32
  }
  func.func @transform_4(%arg0: i32) -> (i32, i32) {
    %c0_i32 = arith.constant 0 : i32
    %c0_i32_0 = arith.constant 0 : i32
    %c0_i32_1 = arith.constant 0 : i32
    return %c0_i32, %c0_i32_0 : i32, i32
  }
  func.func @transform_5(%arg0: i32) -> (i32, i32) {
    %c0_i32 = arith.constant 0 : i32
    %c0_i32_0 = arith.constant 0 : i32
    %c0_i32_1 = arith.constant 0 : i32
    return %c0_i32, %c0_i32_0 : i32, i32
  }
  func.func @transform_6(%arg0: i32) -> (i32, i32) {
    %c0_i32 = arith.constant 0 : i32
    %c0_i32_0 = arith.constant 0 : i32
    return %arg0, %c0_i32 : i32, i32
  }
}

</mosaic_0001>

<bundles_post_ra>
// kernel: acas_forward.1
= control target key start
LH: loop header
LB: loop body
LE: loop exit
PB: predicated region body
PF: predicated region fallthrough
CT: control target
= control target key end

     0   :  { %11 = vsyncpa [#allocation3], 0  ;;  %s1197_s21 = smov 0   ;;  %s1264_s0 = inlined_call_operand.vmem [shape: bf16[24,8], index: 0, kind: input, shape index: {}]   ;;  %s1265_s1 = inlined_call_operand.vmem [shape: bf16[8,128], index: 1, kind: input, shape index: {}]   ;;  %s1266_s2 = inlined_call_operand.hbm [shape: bf16[5,128,128], index: 2, kind: input, shape index: {}]   ;;  %s1267_s3 = inlined_call_operand.vmem [shape: bf16[128,8], index: 3, kind: input, shape index: {}]   ;;  %s1268_s4 = inlined_call_operand.vmem [shape: f32[8,128], index: 4, kind: input, shape index: {}]   ;;  %s1269_s5 = inlined_call_operand.vmem [shape: f32[1,8], index: 5, kind: input, shape index: {}]   ;;  %s1270_s6 = inlined_call_operand.vmem [shape: f32[24,8], index: 6, kind: output, shape index: {}]  }
   0x1 LB: > { %s193_s24 = sshll.u32 %s1266_s2, 4  ;;  %s843_s25 = sadd.s32 4294967295, %s1157_s21   ;;  %s1157_s21 = sphi %s1197_s21, %s17_s21   ;;  %s194_s24 = int_to_ptr.hbm [resolvable:$true] %s193_s24 }
   0x2   : > { %p845_p0 = scmp.ge.s32.totalorder %s1157_s21, 1  ;;  %p179_p1 = scmp.lt.s32.totalorder %s1157_s21, 4 }
   0x3   : > { %p1103_p2 = scmp.eq.s32.totalorder %s843_s25, 0  ;;  %s1159_s26 = smov [#allocation2]  }
   0x4   : > { %p180_p3 = pnand %p845_p0, %p179_p1  ;;  %s195_s27 = sshll.u32 %s1159_s26, 4  ;;  %s196_s27 = int_to_ptr.vmem [resolvable:$true] %s195_s27 }
   0x5   : > { %s1160_s28 = smov 64   ;;  %s1161_s29 = smov 4  }
   0x6   : > { %p1099_p4 = pneg %p180_p3  ;;  %227 = sbr.rel (%p180_p3) target bundleno = 962 (0x3c2), region = 44 }
   0x8   : > { %p1100_p5 = pnand %p1103_p2, %p1099_p4 }
   0xa   : > { %1102 = dma.hbm_to_vmem [thread:$0]  (!%p1100_p5), %s194_s24, 5120, %s196_s27, [#allocation3], %s1160_s28, %s1160_s28, %s1161_s29  }
   0xb   : > { %1152 = dma.done.wait (%p1103_p2), [#allocation3], 5120  }
   0xc   : > { %1154 = vsyncadd (%p1103_p2), [#allocation3], 4294962176  ;;  %p256_p6 = scmp.lt.s32.totalorder %s843_s25, 2  ;;  %vm273_vm0 = vcmask 1043456   ;;  %v267_v0 = vld [vmem:[%s1265_s1] sm:$0xf] }
   0xd   : > { %v1054_v1 = vld [vmem:[#allocation2 + $0x38] sm:$0xff]  ;;  %v275_v2 = vsel %vm273_vm0, %v267_v0, 0  ;;  %vm269_vm1 = vcmask 64512   ;;  %v1053_v4 = vld [vmem:[#allocation2 + $0x30] sm:$0xff]  ;;  %v1052_v5 = vld [vmem:[#allocation2 + $0x28] sm:$0xff] }
   0xe   : > { %s1272_s25 = smov (!%p256_p6, %s843_s25), 2  ;;  %284 = vmatpush.bf16.msra.mxu0 %v275_v2  ;;  %357 = vmatpush.bf16.msra.mxu1 %v1054_v1  ;;  %v1051_v6 = vld [vmem:[#allocation2 + $0x20] sm:$0xff]  ;;  %v1050_v7 = vld [vmem:[#allocation2 + $0x18] sm:$0xff]  ;;  %v1049_v8 = vld [vmem:[#allocation2 + $0x10] sm:$0xff] }
   0xf   : > { %s850_s30 = sshll.u32 %s1272_s25, 2  ;;  %v1048_v9 = vld [vmem:[#allocation2 + $0x8] sm:$0xff]  ;;  %v1047_v10 = vld [vmem:[#allocation2] sm:$0xff]  ;;  %v1062_v11 = vld [vmem:[#allocation2 + $0x78] sm:$0xff]  ;;  %s851_s8 = sshll.u32 %s1272_s25, 3 }
  0x10   : > { %s259_s9 = scalar_lea.vmem %s1264_s0, %s850_s30  ;;  %438 = vmatpush.bf16.msra.mxu2 %v1062_v11  ;;  %v1061_v12 = vld [vmem:[#allocation2 + $0x70] sm:$0xff]  ;;  %v1060_v13 = vld [vmem:[#allocation2 + $0x68] sm:$0xff]  ;;  %v1059_v14 = vld [vmem:[#allocation2 + $0x60] sm:$0xff]  ;;  %s263_s13 = scalar_lea.vmem %s1270_s6, %s851_s8 }
  0x11   : > { %v266_v3 = vld [vmem:[%s259_s9] sm:$0xf]  ;;  %v1058_v15 = vld [vmem:[#allocation2 + $0x58] sm:$0xff]  ;;  %v1057_v17 = vld [vmem:[#allocation2 + $0x50] sm:$0xff] }
  0x12   : > { %852 = vmatmul.msk.bf16.vlgmr.msra.gmra.mxu0 %vm269_vm1, %v266_v3  ;;  %358 = vmatpush.bf16.msra.mxu1 %v1053_v4  ;;  %v1221_v16 = vld [vmem:[%s1268_s4] sm:$0xff]  ;;  %v1056_v24 = vld [vmem:[#allocation2 + $0x48] sm:$0xff]  ;;  %v1070_v26 = vld [vmem:[#allocation2 + $0xb8] sm:$0xff] }
  0x13   : > { %v268_v18 = vperm.slane %v1221_v16, 0  ;;  %v1055_v25 = vld [vmem:[#allocation2 + $0x40] sm:$0xff]  ;;  %519 = vmatpush.bf16.msra.mxu3 %v1070_v26  ;;  %v1069_v27 = vld [vmem:[#allocation2 + $0xb0] sm:$0xff]  ;;  %v1068_v28 = vld [vmem:[#allocation2 + $0xa8] sm:$0xff]  ;;  %v308_v32 = vperm.slane %v1221_v16, 1  ;;  %v389_v46 = vperm.slane %v1221_v16, 2 }
  0x14   : > { %439 = vmatpush.bf16.msra.mxu2 %v1061_v12  ;;  %v1067_v29 = vld [vmem:[#allocation2 + $0xa0] sm:$0xff]  ;;  %v1066_v30 = vld [vmem:[#allocation2 + $0x98] sm:$0xff]  ;;  %v1065_v31 = vld [vmem:[#allocation2 + $0x90] sm:$0xff]  ;;  %v470_v60 = vperm.slane %v1221_v16, 3 }
  0x15   : > { %v1064_v38 = vld [vmem:[#allocation2 + $0x88] sm:$0xff]  ;;  %v1063_v39 = vld [vmem:[#allocation2 + $0x80] sm:$0xff]  ;;  %v1078_v40 = vld [vmem:[#allocation2 + $0xf8] sm:$0xff] }
  0x16   : > { %359 = vmatpush.bf16.msra.mxu1 %v1052_v5  ;;  %600 = vmatpush.bf16.msrb.mxu0 %v1078_v40  ;;  %v1077_v41 = vld [vmem:[#allocation2 + $0xf0] sm:$0xff]  ;;  %v1076_v42 = vld [vmem:[#allocation2 + $0xe8] sm:$0xff]  ;;  %v1075_v43 = vld [vmem:[#allocation2 + $0xe0] sm:$0xff] }
  0x17   : > { %520 = vmatpush.bf16.msra.mxu3 %v1069_v27  ;;  %v1074_v44 = vld [vmem:[#allocation2 + $0xd8] sm:$0xff]  ;;  %v1073_v45 = vld [vmem:[#allocation2 + $0xd0] sm:$0xff]  ;;  %v1072_v52 = vld [vmem:[#allocation2 + $0xc8] sm:$0xff] }
  0x18   : > { %440 = vmatpush.bf16.msra.mxu2 %v1060_v13  ;;  %v1071_v53 = vld [vmem:[#allocation2 + $0xc0] sm:$0xff]  ;;  %v1086_v54 = vld [vmem:[#allocation2 + $0x138] sm:$0xff]  ;;  %v1085_v55 = vld [vmem:[#allocation2 + $0x130] sm:$0xff] }
  0x19   : > { %v1084_v56 = vld [vmem:[#allocation2 + $0x128] sm:$0xff]  ;;  %v1083_v57 = vld [vmem:[#allocation2 + $0x120] sm:$0xff]  ;;  %v1082_v58 = vld [vmem:[#allocation2 + $0x118] sm:$0xff] }
  0x1a   : > { %360 = vmatpush.bf16.msra.mxu1 %v1051_v6  ;;  %601 = vmatpush.bf16.msrb.mxu0 %v1077_v41  ;;  %v1081_v59 = vld [vmem:[#allocation2 + $0x110] sm:$0xff]  ;;  %v1080_v2 = vld [vmem:[#allocation2 + $0x108] sm:$0xff]  ;;  %v1079_v3 = vld [vmem:[#allocation2 + $0x100] sm:$0xff] }
  0x1b   : > { %521 = vmatpush.bf16.msra.mxu3 %v1068_v28  ;;  %v1094_v4 = vld [vmem:[%s1267_s3 + $0x38] sm:$0xff]  ;;  %v1093_v5 = vld [vmem:[%s1267_s3 + $0x30] sm:$0xff]  ;;  %v1092_v6 = vld [vmem:[%s1267_s3 + $0x28] sm:$0xff] }
  0x1c   : > { %441 = vmatpush.bf16.msra.mxu2 %v1059_v14 }
  0x1e   : > { %361 = vmatpush.bf16.msra.mxu1 %v1050_v7  ;;  %602 = vmatpush.bf16.msrb.mxu0 %v1076_v42  ;;  %v1091_v7 = vld [vmem:[%s1267_s3 + $0x20] sm:$0xff] }
  0x1f   : > { %522 = vmatpush.bf16.msra.mxu3 %v1067_v29 }
  0x20   : > { %442 = vmatpush.bf16.msra.mxu2 %v1058_v15 }
  0x22   : > { %362 = vmatpush.bf16.msra.mxu1 %v1049_v8  ;;  %603 = vmatpush.bf16.msrb.mxu0 %v1075_v43  ;;  %v1090_v8 = vld [vmem:[%s1267_s3 + $0x18] sm:$0xff] }
  0x23   : > { %523 = vmatpush.bf16.msra.mxu3 %v1066_v30 }
  0x24   : > { %443 = vmatpush.bf16.msra.mxu2 %v1057_v17  ;;  %v1088_v17 = vld [vmem:[%s1267_s3 + $0x8] sm:$0xff] }
  0x26   : > { %363 = vmatpush.bf16.msra.mxu1 %v1048_v9  ;;  %604 = vmatpush.bf16.msrb.mxu0 %v1074_v44  ;;  %v1089_v9 = vld [vmem:[%s1267_s3 + $0x10] sm:$0xff] }
  0x27   : > { %524 = vmatpush.bf16.msra.mxu3 %v1065_v31 }
  0x28   : > { %444 = vmatpush.bf16.msra.mxu2 %v1056_v24 }
  0x2a   : > { %364 = vmatpush.bf16.msra.mxu1 %v1047_v10  ;;  %605 = vmatpush.bf16.msrb.mxu0 %v1073_v45  ;;  %v551_v10 = vperm.slane %v1221_v16, 4 }
  0x2b   : > { %525 = vmatpush.bf16.msra.mxu3 %v1064_v38 }
  0x2c   : > { %445 = vmatpush.bf16.msra.mxu2 %v1055_v25  ;;  %v1116_v25 = vld [vmem:[%s1269_s5] ss:$0 sm:$0xff] }
  0x2e   : > { %606 = vmatpush.bf16.msrb.mxu0 %v1072_v52  ;;  %681 = vmatpush.bf16.msrb.mxu1 %v1086_v54 }
  0x2f   : > { %526 = vmatpush.bf16.msra.mxu3 %v1063_v39 }
  0x30   : > { %764 = vmatpush.bf16.msrb.mxu2 %v1094_v4 }
  0x32   : > { %607 = vmatpush.bf16.msrb.mxu0 %v1071_v53  ;;  %682 = vmatpush.bf16.msrb.mxu1 %v1085_v55 }
  0x34   : > { %765 = vmatpush.bf16.msrb.mxu2 %v1093_v5 }
  0x36   : > { %683 = vmatpush.bf16.msrb.mxu1 %v1084_v56 }
  0x38   : > { %766 = vmatpush.bf16.msrb.mxu2 %v1092_v6 }
  0x3a   : > { %684 = vmatpush.bf16.msrb.mxu1 %v1083_v57 }
  0x3c   : > { %767 = vmatpush.bf16.msrb.mxu2 %v1091_v7 }
  0x3e   : > { %685 = vmatpush.bf16.msrb.mxu1 %v1082_v58 }
  0x40   : > { %768 = vmatpush.bf16.msrb.mxu2 %v1090_v8 }
  0x42   : > { %686 = vmatpush.bf16.msrb.mxu1 %v1081_v59 }
  0x44   : > { %769 = vmatpush.bf16.msrb.mxu2 %v1089_v9 }
  0x46   : > { %687 = vmatpush.bf16.msrb.mxu1 %v1080_v2 }
  0x48   : > { %770 = vmatpush.bf16.msrb.mxu2 %v1088_v17 }
  0x4a   : > { %688 = vmatpush.bf16.msrb.mxu1 %v1079_v3 }
  0x8f   : > { %v286_v19 = vpop.f32.mrf.mxu0 }
  0x90   : > { %v287_v20 = vadd.f32 %v286_v19, %v268_v18  ;;  %v1087_v18 = vld [vmem:[%s1267_s3] sm:$0xff]  ;;  %v632_v19 = vperm.slane %v1221_v16, 5 }
  0x91   : > { %771 = vmatpush.bf16.msrb.mxu2 %v1087_v18 }
  0x92   : > { %v290_v21 = vmax.f32 %v287_v20, 0.0 }
  0x94   : > { %v291_v22 = vpack.c.bf16 %v290_v21, %v290_v21 }
  0x96   : > { %365 = vmatmul.bf16.vlgmr.msra.gmra.mxu1 %v291_v22 }
  0x97   : > { %v288_v23 = vpop.f32.mrf.mxu0 }
 0x113   : > { %v366_v33 = vpop.f32.mrf.mxu1 }
 0x114   : > { %v367_v34 = vadd.f32 %v366_v33, %v308_v32 }
 0x116   : > { %v370_v35 = vmax.f32 %v367_v34, 0.0 }
 0x118   : > { %v371_v36 = vpack.c.bf16 %v370_v35, %v370_v35 }
 0x11a   : > { %446 = vmatmul.bf16.vlgmr.msra.gmra.mxu2 %v371_v36 }
 0x11b   : > { %v368_v37 = vpop.f32.mrf.mxu1 }
 0x19d   : > { %v447_v47 = vpop.f32.mrf.mxu2 }
 0x19e   : > { %v448_v48 = vadd.f32 %v447_v47, %v389_v46 }
 0x1a0   : > { %v451_v49 = vmax.f32 %v448_v48, 0.0 }
 0x1a2   : > { %v452_v50 = vpack.c.bf16 %v451_v49, %v451_v49 }
 0x1a4   : > { %527 = vmatmul.bf16.vlgmr.msra.gmra.mxu3 %v452_v50 }
 0x1a5   : > { %v449_v51 = vpop.f32.mrf.mxu2 }
 0x227   : > { %v528_v61 = vpop.f32.mrf.mxu3 }
 0x228   : > { %v529_v62 = vadd.f32 %v528_v61, %v470_v60 }
 0x22a   : > { %v532_v63 = vmax.f32 %v529_v62, 0.0 }
 0x22c   : > { %v533_v0 = vpack.c.bf16 %v532_v63, %v532_v63 }
 0x22e   : > { %608 = vmatmul.bf16.vlgmr.msrb.gmra.mxu0 %v533_v0 }
 0x22f   : > { %v530_v1 = vpop.f32.mrf.mxu3 }
 0x2ab   : > { %v609_v11 = vpop.f32.mrf.mxu0 }
 0x2ac   : > { %v610_v12 = vadd.f32 %v609_v11, %v551_v10 }
 0x2ae   : > { %v613_v13 = vmax.f32 %v610_v12, 0.0 }
 0x2b0   : > { %v614_v14 = vpack.c.bf16 %v613_v13, %v613_v13 }
 0x2b2   : > { %689 = vmatmul.bf16.vlgmr.msrb.gmra.mxu1 %v614_v14 }
 0x2b3   : > { %v611_v15 = vpop.f32.mrf.mxu0 }
 0x32f   : > { %v690_v20 = vpop.f32.mrf.mxu1 }
 0x330   : > { %v691_v21 = vadd.f32 %v690_v20, %v632_v19 }
 0x332   : > { %v694_v22 = vmax.f32 %v691_v21, 0.0 }
 0x334   : > { %v695_v23 = vpack.c.bf16 %v694_v22, %v694_v22 }
 0x336   : > { %772 = vmatmul.bf16.vlgmr.msrb.gmra.mxu2 %v695_v23 }
 0x337   : > { %v692_v24 = vpop.f32.mrf.mxu1 }
 0x3b9   : > { %v773_v26 = vpop.f32.mrf.mxu2 }
 0x3ba   : > { %v774_v27 = vadd.f32 %v1116_v25, %v773_v26 }
 0x3bc   : > { %777 = vst.msk [vmem:[%s263_s13] sm:$0xff] %vm269_vm1, %v774_v27 }
 0x3c1   : > { %v775_v16 = vpop.f32.mrf.mxu2 }
 0x3c2 PF: > { %s17_s21 = sadd.s32 1, %s1157_s21  }
 0x3c3   : > { %p14_p7 = scmp.ge.s32.totalorder %s17_s21, 5  }
 0x3c5   :  { %16 = sbr.rel (!%p14_p7) target bundleno = 1 (0x1), region = 83 }
 0x3ca   :  { %797 = vsyncpa [#allocation3], 1 }
 0x3cb   :  { %799 = vsyncpa [#allocation3 + $0x1], 1 }

</bundles_post_ra>
